<compile_context>
chip_gen: v6e
topology: v6e:2x2x1
jax: 0.10.0
libtpu: 0.0.40
codegen_flags: <defaults>
</compile_context>

<pallas_src>
import functools

import jax
import jax.numpy as jnp
from jax.experimental import pallas as pl
from jax.experimental.pallas import tpu as pltpu

HIDDEN = 256


def actor_critic_kernel(x_ref, w1_ref, b1_ref, w2_ref, b2_ref, wh_ref, bh_ref,
                        out_ref, *, action_size):
    """One batch tile: x (TB, S) -> fused head (TB, HEAD) = [pi | v | pad]."""
    w_dtype = w1_ref.dtype  # f32 or bf16 (matmul operands only)

    x = x_ref[...]                                                   # (TB, S), already w_dtype

    # d1 + relu (bias add / relu always in f32)
    h1 = jnp.dot(x, w1_ref[...], preferred_element_type=jnp.float32) + b1_ref[...]
    h1 = jnp.maximum(h1, 0.0)                                        # (TB, 256) f32

    # d2 + relu
    h2 = jnp.dot(h1.astype(w_dtype), w2_ref[...],
                 preferred_element_type=jnp.float32) + b2_ref[...]
    h2 = jnp.maximum(h2, 0.0)                                        # (TB, 256) f32

    # fused policy+value head: cols [0, A) = pi logits, col A = v, rest zero.
    head = jnp.dot(h2.astype(w_dtype), wh_ref[...],
                   preferred_element_type=jnp.float32) + bh_ref[...]  # (TB, HEAD) f32

    col = jax.lax.broadcasted_iota(jnp.int32, head.shape, 1)
    is_logit = col < action_size

    # masked, max-subtracted softmax over the first `action_size` columns (f32).
    logits = jnp.where(is_logit, head, jnp.float32(-1e30))
    m = jnp.max(logits, axis=-1, keepdims=True)
    e = jnp.where(is_logit, jnp.exp(logits - m), 0.0)
    denom = jnp.sum(e, axis=-1, keepdims=True)
    pi = e / denom            # exact divide: row sums == 1 to float rounding

    # pi is already zero outside the logit columns; add the value column in.
    out_ref[...] = pi + jnp.where(col == action_size, head, 0.0)


def actor_critic_forward(x, params, *, tile_b=1024, use_bf16=False):
    """ActorCritic forward via one Pallas kernel, batch-tiled over a 1-D grid.

    x: (batch, state_size) float32
    params: dict with w1,b1,w2,b2,wpi,bpi,wv,bv (weights stored (in, out)).
    Returns (pi, v) with pi (batch, action_size) and v (batch, 1).
    """
    batch, state_size = x.shape
    action_size = params["wpi"].shape[1]
    hidden = params["w1"].shape[1]
    head_w = pl.cdiv(action_size + 1, 8) * 8   # fused head width: [pi | v | pad]

    # ---- batch tiling: sublane-aligned, overhead-amortizing, >=2 steps when
    #      there is enough work for both v7x TensorCores ----
    b8 = pl.cdiv(batch, 8) * 8
    tile = pl.cdiv(min(tile_b, b8), 8) * 8
    if b8 > 256 and pl.cdiv(b8, tile) < 2:
        tile = pl.cdiv(pl.cdiv(b8, 2), 8) * 8
    b_pad = pl.cdiv(b8, tile) * tile
    grid = (b_pad // tile,)

    # bf16 matmul operands for the v6e/v7x MXU fast path (f32 accumulation,
    # biases / relu / softmax stay f32).
    w_dtype = jnp.bfloat16 if use_bf16 else jnp.float32

    # ---- one-time packing / padding in plain JAX (cheap, no feature-dim pad) ----
    x_cast = x.astype(w_dtype)
    if b_pad != batch:
        x_p = jnp.zeros((b_pad, state_size), w_dtype).at[:batch, :].set(x_cast)
    else:
        x_p = x_cast

    w1 = params["w1"].astype(w_dtype)                              # (S, 256)
    b1 = params["b1"].reshape(1, hidden).astype(jnp.float32)
    w2 = params["w2"].astype(w_dtype)                              # (256, 256)
    b2 = params["b2"].reshape(1, hidden).astype(jnp.float32)

    wh = (jnp.zeros((hidden, head_w), jnp.float32)
          .at[:, :action_size].set(params["wpi"])
          .at[:, action_size:action_size + 1].set(params["wv"])).astype(w_dtype)
    bh = (jnp.zeros((1, head_w), jnp.float32)
          .at[:, :action_size].set(params["bpi"].reshape(1, action_size))
          .at[:, action_size:action_size + 1].set(params["bv"].reshape(1, 1)))

    itemsize = jnp.dtype(w_dtype).itemsize
    flops = 2 * b_pad * (state_size * hidden + hidden * hidden + hidden * head_w)
    bytes_accessed = (x_p.size * itemsize
                      + b_pad * head_w * 4
                      + (w1.size + w2.size + wh.size) * itemsize
                      + (b1.size + b2.size + bh.size) * 4)
    cost = pl.CostEstimate(flops=flops,
                           transcendentals=b_pad * head_w,
                           bytes_accessed=bytes_accessed)

    resident = lambda i: (0, 0)   # weights/biases: same block every grid step
    fused = pl.pallas_call(
        functools.partial(actor_critic_kernel, action_size=action_size),
        out_shape=jax.ShapeDtypeStruct((b_pad, head_w), jnp.float32),
        grid=grid,
        in_specs=[
            pl.BlockSpec((tile, state_size), lambda i: (i, 0)),   # x tile (unpadded S)
            pl.BlockSpec((state_size, hidden), resident),         # W1
            pl.BlockSpec((1, hidden), resident),                  # b1
            pl.BlockSpec((hidden, hidden), resident),             # W2
            pl.BlockSpec((1, hidden), resident),                  # b2
            pl.BlockSpec((hidden, head_w), resident),             # fused Wpi|Wv
            pl.BlockSpec((1, head_w), resident),                  # fused bpi|bv
        ],
        out_specs=pl.BlockSpec((tile, head_w), lambda i: (i, 0)),
        compiler_params=pltpu.CompilerParams(
            dimension_semantics=("parallel",),
            vmem_limit_bytes=48 * 1024 * 1024,
        ),
        cost_estimate=cost,
    )(x_p, w1, b1, w2, b2, wh, bh)

    pi = fused[:batch, :action_size]
    v = fused[:batch, action_size:action_size + 1]
    return pi, v


def init_params(key, state_size=5, action_size=5, hidden=HIDDEN):
    """Deterministic synthetic init (shapes match the nn.Linear layers)."""
    ks = jax.random.split(key, 8)

    def lin(kw, kb, fan_in, fan_out):
        # torch Linear default: U(-1/sqrt(fan_in), 1/sqrt(fan_in))
        bound = 1.0 / jnp.sqrt(jnp.float32(fan_in))
        w = jax.random.uniform(kw, (fan_in, fan_out), jnp.float32, -bound, bound)
        b = jax.random.uniform(kb, (1, fan_out), jnp.float32, -bound, bound)
        return w, b

    w1, b1 = lin(ks[0], ks[1], state_size, hidden)
    w2, b2 = lin(ks[2], ks[3], hidden, hidden)
    wpi, bpi = lin(ks[4], ks[5], hidden, action_size)
    wv, bv = lin(ks[6], ks[7], hidden, 1)
    return dict(w1=w1, b1=b1, w2=w2, b2=b2, wpi=wpi, bpi=bpi, wv=wv, bv=bv)


def reference_forward(x, p):
    P = jax.lax.Precision.HIGHEST
    h1 = jax.nn.relu(jnp.dot(x, p["w1"], precision=P) + p["b1"])
    h2 = jax.nn.relu(jnp.dot(h1, p["w2"], precision=P) + p["b2"])
    pi = jax.nn.softmax(jnp.dot(h2, p["wpi"], precision=P) + p["bpi"], axis=-1)
    v = jnp.dot(h2, p["wv"], precision=P) + p["bv"]
    return pi, v


if __name__ == "__main__":
    key = jax.random.PRNGKey(0)
    k_x, k_p, k_x2 = jax.random.split(key, 3)

    batch, state_size, action_size = 8, 5, 5
    x = jax.random.normal(k_x, (batch, state_size), jnp.float32)
    params = init_params(k_p, state_size=state_size, action_size=action_size)

    # --- f32 path, small-batch single grid step (8-row sublane-aligned tile) ---
    pi, v = actor_critic_forward(x, params, use_bf16=False)
    pi, v = jax.block_until_ready(pi), jax.block_until_ready(v)
    pi_ref, v_ref = reference_forward(x, params)
    assert pi.shape == (batch, action_size) and v.shape == (batch, 1)
    assert jnp.allclose(pi, pi_ref, atol=1e-3)
    assert jnp.allclose(v, v_ref, atol=1e-3)
    assert jnp.allclose(jnp.sum(pi, axis=-1), 1.0, atol=1e-3)

    # --- multi-tile grid path (batch > 256 -> split into >=2 parallel tiles) ---
    batch2 = 300
    x2 = jax.random.normal(k_x2, (batch2, state_size), jnp.float32)
    pi2, v2 = actor_critic_forward(x2, params, use_bf16=False)
    jax.block_until_ready((pi2, v2))
    pi2_ref, v2_ref = reference_forward(x2, params)
    assert pi2.shape == (batch2, action_size) and v2.shape == (batch2, 1)
    assert jnp.allclose(pi2, pi2_ref, atol=1e-3)
    assert jnp.allclose(v2, v2_ref, atol=1e-3)
    assert jnp.allclose(jnp.sum(pi2, axis=-1), 1.0, atol=1e-3)

    # --- bf16 matmul-operand path (v6e/v7x MXU fast path), f32 elsewhere ---
    pi3, v3 = actor_critic_forward(x, params, use_bf16=True)
    jax.block_until_ready((pi3, v3))
    assert jnp.allclose(pi3, pi_ref, atol=3e-2)
    assert jnp.allclose(v3, v_ref, atol=3e-2)
    assert jnp.allclose(jnp.sum(pi3, axis=-1), 1.0, atol=1e-3)

    print("KERNEL_OK")
</pallas_src>

<mosaic_0001>
module attributes {stable_mosaic.version = 11 : i64} {
  func.func @actor_critic_kernel(%arg0: i32, %arg1: memref<8x5xf32, #tpu.memory_space<vmem>>, %arg2: memref<5x256xf32, #tpu.memory_space<vmem>>, %arg3: memref<1x256xf32, #tpu.memory_space<vmem>>, %arg4: memref<256x256xf32, #tpu.memory_space<vmem>>, %arg5: memref<1x256xf32, #tpu.memory_space<vmem>>, %arg6: memref<256x8xf32, #tpu.memory_space<vmem>>, %arg7: memref<1x8xf32, #tpu.memory_space<vmem>>, %arg8: memref<8x8xf32, #tpu.memory_space<vmem>>) attributes {dimension_semantics = [#tpu.dimension_semantics<parallel>], iteration_bounds = array<i64: 1>, scalar_prefetch = 0 : i64, scratch_operands = 0 : i64, tpu.core_type = #tpu.core_type<tc>, window_params = [{transform_indices = @transform_0, window_bounds = array<i64: 8, 5>}, {pipeline_mode = #tpu.pipeline_mode<synchronous>, transform_indices = @transform_1, window_bounds = array<i64: 5, 256>}, {pipeline_mode = #tpu.pipeline_mode<synchronous>, transform_indices = @transform_2, window_bounds = array<i64: 1, 256>}, {pipeline_mode = #tpu.pipeline_mode<synchronous>, transform_indices = @transform_3, window_bounds = array<i64: 256, 256>}, {pipeline_mode = #tpu.pipeline_mode<synchronous>, transform_indices = @transform_4, window_bounds = array<i64: 1, 256>}, {pipeline_mode = #tpu.pipeline_mode<synchronous>, transform_indices = @transform_5, window_bounds = array<i64: 256, 8>}, {pipeline_mode = #tpu.pipeline_mode<synchronous>, transform_indices = @transform_6, window_bounds = array<i64: 1, 8>}, {transform_indices = @transform_7, window_bounds = array<i64: 8, 8>}]} {
    %c0 = arith.constant 0 : index
    %c0_0 = arith.constant 0 : index
    %0 = vector.load %arg1[%c0, %c0_0] : memref<8x5xf32, #tpu.memory_space<vmem>>, vector<8x5xf32>
    %c0_1 = arith.constant 0 : index
    %c0_2 = arith.constant 0 : index
    %1 = vector.load %arg2[%c0_1, %c0_2] : memref<5x256xf32, #tpu.memory_space<vmem>>, vector<5x256xf32>
    %cst = arith.constant dense<0.000000e+00> : vector<8x256xf32>
    %2 = tpu.matmul %0, %1, %cst {dimension_numbers = #tpu.dot_dimension_numbers<[1], [0], [0], [1], [0, 0, 1, 1], [], []>} : vector<8x5xf32>, vector<5x256xf32>, vector<8x256xf32> -> vector<8x256xf32>
    %c0_3 = arith.constant 0 : index
    %c0_4 = arith.constant 0 : index
    %3 = vector.load %arg3[%c0_3, %c0_4] : memref<1x256xf32, #tpu.memory_space<vmem>>, vector<1x256xf32>
    %4 = vector.broadcast %3 : vector<1x256xf32> to vector<8x256xf32>
    %5 = arith.addf %2, %4 : vector<8x256xf32>
    %cst_5 = arith.constant 0.000000e+00 : f32
    %6 = vector.broadcast %cst_5 : f32 to vector<8x256xf32>
    %7 = arith.maximumf %5, %6 : vector<8x256xf32>
    %c0_6 = arith.constant 0 : index
    %c0_7 = arith.constant 0 : index
    %8 = vector.load %arg4[%c0_6, %c0_7] : memref<256x256xf32, #tpu.memory_space<vmem>>, vector<256x256xf32>
    %cst_8 = arith.constant dense<0.000000e+00> : vector<8x256xf32>
    %9 = tpu.matmul %7, %8, %cst_8 {dimension_numbers = #tpu.dot_dimension_numbers<[1], [0], [0], [1], [0, 0, 1, 1], [], []>} : vector<8x256xf32>, vector<256x256xf32>, vector<8x256xf32> -> vector<8x256xf32>
    %c0_9 = arith.constant 0 : index
    %c0_10 = arith.constant 0 : index
    %10 = vector.load %arg5[%c0_9, %c0_10] : memref<1x256xf32, #tpu.memory_space<vmem>>, vector<1x256xf32>
    %11 = vector.broadcast %10 : vector<1x256xf32> to vector<8x256xf32>
    %12 = arith.addf %9, %11 : vector<8x256xf32>
    %cst_11 = arith.constant 0.000000e+00 : f32
    %13 = vector.broadcast %cst_11 : f32 to vector<8x256xf32>
    %14 = arith.maximumf %12, %13 : vector<8x256xf32>
    %c0_12 = arith.constant 0 : index
    %c0_13 = arith.constant 0 : index
    %15 = vector.load %arg6[%c0_12, %c0_13] : memref<256x8xf32, #tpu.memory_space<vmem>>, vector<256x8xf32>
    %cst_14 = arith.constant dense<0.000000e+00> : vector<8x8xf32>
    %16 = tpu.matmul %14, %15, %cst_14 {dimension_numbers = #tpu.dot_dimension_numbers<[1], [0], [0], [1], [0, 0, 1, 1], [], []>} : vector<8x256xf32>, vector<256x8xf32>, vector<8x8xf32> -> vector<8x8xf32>
    %c0_15 = arith.constant 0 : index
    %c0_16 = arith.constant 0 : index
    %17 = vector.load %arg7[%c0_15, %c0_16] : memref<1x8xf32, #tpu.memory_space<vmem>>, vector<1x8xf32>
    %18 = vector.broadcast %17 : vector<1x8xf32> to vector<8x8xf32>
    %19 = arith.addf %16, %18 : vector<8x8xf32>
    %20 = tpu.iota {dimensions = array<i32: 1>} : vector<8x8xi32>
    %c5_i32 = arith.constant 5 : i32
    %21 = vector.broadcast %c5_i32 : i32 to vector<8x8xi32>
    %22 = arith.cmpi slt, %20, %21 : vector<8x8xi32>
    %cst_17 = arith.constant -1.000000e+30 : f32
    %23 = vector.broadcast %cst_17 : f32 to vector<8x8xf32>
    %24 = arith.select %22, %19, %23 : vector<8x8xi1>, vector<8x8xf32>
    %cst_18 = arith.constant dense<0xFF800000> : vector<8xf32>
    %25 = vector.multi_reduction <maximumf>, %24, %cst_18 [1] : vector<8x8xf32> to vector<8xf32>
    %26 = vector.shape_cast %25 : vector<8xf32> to vector<8x1xf32>
    %27 = vector.broadcast %26 : vector<8x1xf32> to vector<8x8xf32>
    %28 = arith.subf %24, %27 : vector<8x8xf32>
    %29 = math.exp %28 : vector<8x8xf32>
    %cst_19 = arith.constant 0.000000e+00 : f32
    %30 = vector.broadcast %cst_19 : f32 to vector<8x8xf32>
    %31 = arith.select %22, %29, %30 : vector<8x8xi1>, vector<8x8xf32>
    %cst_20 = arith.constant dense<0.000000e+00> : vector<8xf32>
    %32 = vector.multi_reduction <add>, %31, %cst_20 [1] : vector<8x8xf32> to vector<8xf32>
    %33 = vector.shape_cast %32 : vector<8xf32> to vector<8x1xf32>
    %34 = vector.broadcast %33 : vector<8x1xf32> to vector<8x8xf32>
    %35 = arith.divf %31, %34 : vector<8x8xf32>
    %c5_i32_21 = arith.constant 5 : i32
    %36 = vector.broadcast %c5_i32_21 : i32 to vector<8x8xi32>
    %37 = arith.cmpi eq, %20, %36 : vector<8x8xi32>
    %cst_22 = arith.constant 0.000000e+00 : f32
    %38 = vector.broadcast %cst_22 : f32 to vector<8x8xf32>
    %39 = arith.select %37, %19, %38 : vector<8x8xi1>, vector<8x8xf32>
    %40 = arith.addf %35, %39 : vector<8x8xf32>
    %c0_23 = arith.constant 0 : index
    %c0_24 = arith.constant 0 : index
    %41 = vector.load %arg8[%c0_23, %c0_24] : memref<8x8xf32, #tpu.memory_space<vmem>>, vector<8x8xf32>
    tpu.vector_store %arg8[%c0_23, %c0_24], %40 {strides = array<i32>} : memref<8x8xf32, #tpu.memory_space<vmem>>, vector<8x8xf32>,
    return
  }
  func.func @transform_0(%arg0: i32) -> (i32, i32) {
    %c0_i32 = arith.constant 0 : i32
    %c0_i32_0 = arith.constant 0 : i32
    return %arg0, %c0_i32 : i32, i32
  }
  func.func @transform_1(%arg0: i32) -> (i32, i32) {
    %c0_i32 = arith.constant 0 : i32
    %c0_i32_0 = arith.constant 0 : i32
    %c0_i32_1 = arith.constant 0 : i32
    return %c0_i32, %c0_i32_0 : i32, i32
  }
  func.func @transform_2(%arg0: i32) -> (i32, i32) {
    %c0_i32 = arith.constant 0 : i32
    %c0_i32_0 = arith.constant 0 : i32
    %c0_i32_1 = arith.constant 0 : i32
    return %c0_i32, %c0_i32_0 : i32, i32
  }
  func.func @transform_3(%arg0: i32) -> (i32, i32) {
    %c0_i32 = arith.constant 0 : i32
    %c0_i32_0 = arith.constant 0 : i32
    %c0_i32_1 = arith.constant 0 : i32
    return %c0_i32, %c0_i32_0 : i32, i32
  }
  func.func @transform_4(%arg0: i32) -> (i32, i32) {
    %c0_i32 = arith.constant 0 : i32
    %c0_i32_0 = arith.constant 0 : i32
    %c0_i32_1 = arith.constant 0 : i32
    return %c0_i32, %c0_i32_0 : i32, i32
  }
  func.func @transform_5(%arg0: i32) -> (i32, i32) {
    %c0_i32 = arith.constant 0 : i32
    %c0_i32_0 = arith.constant 0 : i32
    %c0_i32_1 = arith.constant 0 : i32
    return %c0_i32, %c0_i32_0 : i32, i32
  }
  func.func @transform_6(%arg0: i32) -> (i32, i32) {
    %c0_i32 = arith.constant 0 : i32
    %c0_i32_0 = arith.constant 0 : i32
    %c0_i32_1 = arith.constant 0 : i32
    return %c0_i32, %c0_i32_0 : i32, i32
  }
  func.func @transform_7(%arg0: i32) -> (i32, i32) {
    %c0_i32 = arith.constant 0 : i32
    %c0_i32_0 = arith.constant 0 : i32
    return %arg0, %c0_i32 : i32, i32
  }
}

</mosaic_0001>

<bundles_post_ra>
// kernel: tpu_custom_call.1
= control target key start
LH: loop header
LB: loop body
LE: loop exit
PB: predicated region body
PF: predicated region fallthrough
CT: control target
= control target key end

     0   :  { %12 = vsyncpa [#allocation3], 0  ;;  %s694_s0 = inlined_call_operand.vmem [shape: f32[8,5], index: 0, kind: input, shape index: {}]   ;;  %s695_s1 = inlined_call_operand.vmem [shape: f32[5,256], index: 1, kind: input, shape index: {}]   ;;  %s696_s2 = inlined_call_operand.vmem [shape: f32[1,256], index: 2, kind: input, shape index: {}]   ;;  %s697_s3 = inlined_call_operand.hbm [shape: f32[256,256], index: 3, kind: input, shape index: {}]   ;;  %s698_s4 = inlined_call_operand.vmem [shape: f32[1,256], index: 4, kind: input, shape index: {}]   ;;  %s699_s5 = inlined_call_operand.vmem [shape: f32[256,8], index: 5, kind: input, shape index: {}]   ;;  %s700_s6 = inlined_call_operand.vmem [shape: f32[1,8], index: 6, kind: input, shape index: {}]   ;;  %s701_s7 = inlined_call_operand.hbm [shape: f32[8,8], index: 7, kind: output, shape index: {}]  }
   0x1   :  { %13 = vsyncpa [#allocation4], 0  ;;  %s526_s24 = smov [#allocation2]  }
   0x2   :  { %s25_s25 = sshll.u32 %s526_s24, 4  ;;  %s26_s25 = int_to_ptr.vmem [resolvable:$true] %s25_s25 }
   0x3   :  { %s490_s26 = scalar_lea.vmem %s26_s25, 8192  ;;  %p495_p1 = scmp.lt.s32.totalorder %s26_s25, %s26_s25 }
   0x4   :  { %p491_p0 = scmp.ne.s32.totalorder %s26_s25, %s490_s26  ;;  %p496_p2 = scmp.lt.s32.totalorder %s490_s26, %s490_s26 }
   0x6   :  { %p497_p3 = por %p496_p2, %p495_p1 }
   0x8   :  { %p498_p4 = pnand %p497_p3, %p491_p0 }
   0xa   :  { %501 = shalt.err (!%p498_p4)
}
   0xb   :  { %s527_s27 = smov 256   ;;  %s528_s28 = smov 16  }
   0xc   :  { %31 = dma.hbm_to_vmem [thread:$0]  %s697_s3, 8192, %s26_s25, [#allocation3], %s527_s27, %s527_s27, %s528_s28  }
   0xd   :  { %522 = dma.done.wait [#allocation3], 8192  }
   0xe   :  { %523 = vsyncadd [#allocation3], 4294959104  ;;  %v529_v0 = vmov 0.0   ;;  %vm60_vm0 = vcmask 1044480   ;;  %v43_v1 = vld [vmem:[%s695_s1 + $0x8] sm:$0x1f] }
   0xf   :  { %131 = vmatprep.mubr.f32.mxu0 %v529_v0  ;;  %v42_v2 = vld [vmem:[%s695_s1] sm:$0x1f]  ;;  %vm56_vm1 = vcmask 39936   ;;  %434 = vmatprep.subr.msk.mxu0 %vm60_vm0, %v43_v1  ;;  %v171_v4 = vld [vmem:[#allocation2 + $0xf8] sm:$0xff]  ;;  %v170_v5 = vld [vmem:[#allocation2 + $0xf0] sm:$0xff]  ;;  %vm402_vm4 = vcmask 64512  }
  0x10   :  { %v41_v3 = vld [vmem:[%s694_s0] sm:$0xff]  ;;  %v169_v6 = vld [vmem:[#allocation2 + $0xe8] sm:$0xff]  ;;  %435 = vmatpush1.msk.msra.mxu0 %vm60_vm0, %v42_v2  ;;  %216 = vmatprep.subr.mxu1 %v171_v4  ;;  %v167_v8 = vld [vmem:[#allocation2 + $0xd8] sm:$0xff] }
  0x11   :  { %v168_v7 = vld [vmem:[#allocation2 + $0xe0] sm:$0xff]  ;;  %436 = vmatmul.mubr.msk.f32.vlgmr.msra.gmra.mxu0 %vm56_vm1, %v41_v3  ;;  %217 = vmatpush1.msra.mxu1 %v170_v5  ;;  %v166_v9 = vld [vmem:[#allocation2 + $0xd0] sm:$0xff]  ;;  %v165_v10 = vld [vmem:[#allocation2 + $0xc8] sm:$0xff] }
  0x12   :  { %218 = vmatprep.subr.mxu1 %v169_v6  ;;  %v164_v11 = vld [vmem:[#allocation2 + $0xc0] sm:$0xff]  ;;  %v163_v12 = vld [vmem:[#allocation2 + $0xb8] sm:$0xff]  ;;  %v162_v13 = vld [vmem:[#allocation2 + $0xb0] sm:$0xff] }
  0x13   :  { %219 = vmatpush1.msra.mxu1 %v168_v7  ;;  %v161_v14 = vld [vmem:[#allocation2 + $0xa8] sm:$0xff]  ;;  %v160_v15 = vld [vmem:[#allocation2 + $0xa0] sm:$0xff]  ;;  %v159_v16 = vld [vmem:[#allocation2 + $0x98] sm:$0xff] }
  0x14   :  { %220 = vmatprep.subr.mxu1 %v167_v8  ;;  %v158_v17 = vld [vmem:[#allocation2 + $0x90] sm:$0xff]  ;;  %v157_v18 = vld [vmem:[#allocation2 + $0x88] sm:$0xff]  ;;  %v156_v19 = vld [vmem:[#allocation2 + $0x80] sm:$0xff] }
  0x15   :  { %221 = vmatpush1.msra.mxu1 %v166_v9  ;;  %v155_v20 = vld [vmem:[#allocation2 + $0x78] sm:$0xff]  ;;  %v154_v21 = vld [vmem:[#allocation2 + $0x70] sm:$0xff]  ;;  %v153_v22 = vld [vmem:[#allocation2 + $0x68] sm:$0xff] }
  0x16   :  { %222 = vmatprep.subr.mxu1 %v165_v10  ;;  %v152_v23 = vld [vmem:[#allocation2 + $0x60] sm:$0xff]  ;;  %v151_v24 = vld [vmem:[#allocation2 + $0x58] sm:$0xff]  ;;  %v150_v25 = vld [vmem:[#allocation2 + $0x50] sm:$0xff] }
  0x17   :  { %223 = vmatpush1.msra.mxu1 %v164_v11  ;;  %v149_v26 = vld [vmem:[#allocation2 + $0x48] sm:$0xff]  ;;  %v148_v27 = vld [vmem:[#allocation2 + $0x40] sm:$0xff]  ;;  %v147_v28 = vld [vmem:[#allocation2 + $0x38] sm:$0xff] }
  0x18   :  { %224 = vmatprep.subr.mxu1 %v163_v12  ;;  %v146_v29 = vld [vmem:[#allocation2 + $0x30] sm:$0xff]  ;;  %v145_v30 = vld [vmem:[#allocation2 + $0x28] sm:$0xff]  ;;  %v144_v31 = vld [vmem:[#allocation2 + $0x20] sm:$0xff] }
  0x19   :  { %225 = vmatpush1.msra.mxu1 %v162_v13  ;;  %v143_v32 = vld [vmem:[#allocation2 + $0x18] sm:$0xff]  ;;  %v142_v33 = vld [vmem:[#allocation2 + $0x10] sm:$0xff]  ;;  %v141_v34 = vld [vmem:[#allocation2 + $0x8] sm:$0xff] }
  0x1a   :  { %226 = vmatprep.subr.mxu1 %v161_v14  ;;  %v140_v35 = vld [vmem:[#allocation2] sm:$0xff]  ;;  %v203_v36 = vld [vmem:[#allocation2 + $0x1f8] sm:$0xff]  ;;  %v202_v37 = vld [vmem:[#allocation2 + $0x1f0] sm:$0xff] }
  0x1b   :  { %227 = vmatpush1.msra.mxu1 %v160_v15  ;;  %v201_v38 = vld [vmem:[#allocation2 + $0x1e8] sm:$0xff]  ;;  %v200_v39 = vld [vmem:[#allocation2 + $0x1e0] sm:$0xff]  ;;  %v199_v40 = vld [vmem:[#allocation2 + $0x1d8] sm:$0xff] }
  0x1c   :  { %228 = vmatprep.subr.mxu1 %v159_v16  ;;  %v198_v41 = vld [vmem:[#allocation2 + $0x1d0] sm:$0xff]  ;;  %v197_v42 = vld [vmem:[#allocation2 + $0x1c8] sm:$0xff]  ;;  %v196_v43 = vld [vmem:[#allocation2 + $0x1c0] sm:$0xff] }
  0x1d   :  { %229 = vmatpush1.msra.mxu1 %v158_v17  ;;  %v195_v44 = vld [vmem:[#allocation2 + $0x1b8] sm:$0xff]  ;;  %v194_v45 = vld [vmem:[#allocation2 + $0x1b0] sm:$0xff]  ;;  %v193_v46 = vld [vmem:[#allocation2 + $0x1a8] sm:$0xff] }
  0x1e   :  { %230 = vmatprep.subr.mxu1 %v157_v18  ;;  %v192_v47 = vld [vmem:[#allocation2 + $0x1a0] sm:$0xff]  ;;  %v191_v48 = vld [vmem:[#allocation2 + $0x198] sm:$0xff]  ;;  %v190_v49 = vld [vmem:[#allocation2 + $0x190] sm:$0xff] }
  0x1f   :  { %231 = vmatpush1.msra.mxu1 %v156_v19  ;;  %v189_v50 = vld [vmem:[#allocation2 + $0x188] sm:$0xff]  ;;  %v188_v51 = vld [vmem:[#allocation2 + $0x180] sm:$0xff]  ;;  %v187_v52 = vld [vmem:[#allocation2 + $0x178] sm:$0xff] }
  0x20   :  { %232 = vmatprep.subr.mxu1 %v155_v20  ;;  %v186_v53 = vld [vmem:[#allocation2 + $0x170] sm:$0xff]  ;;  %v185_v54 = vld [vmem:[#allocation2 + $0x168] sm:$0xff]  ;;  %v184_v55 = vld [vmem:[#allocation2 + $0x160] sm:$0xff] }
  0x21   :  { %233 = vmatpush1.msra.mxu1 %v154_v21  ;;  %v183_v56 = vld [vmem:[#allocation2 + $0x158] sm:$0xff]  ;;  %v182_v57 = vld [vmem:[#allocation2 + $0x150] sm:$0xff]  ;;  %v181_v58 = vld [vmem:[#allocation2 + $0x148] sm:$0xff] }
  0x22   :  { %234 = vmatprep.subr.mxu1 %v153_v22  ;;  %v180_v59 = vld [vmem:[#allocation2 + $0x140] sm:$0xff]  ;;  %v179_v60 = vld [vmem:[#allocation2 + $0x138] sm:$0xff]  ;;  %v178_v61 = vld [vmem:[#allocation2 + $0x130] sm:$0xff] }
  0x23   :  { %235 = vmatpush1.msra.mxu1 %v152_v23  ;;  %v177_v62 = vld [vmem:[#allocation2 + $0x128] sm:$0xff]  ;;  %v176_v63 = vld [vmem:[#allocation2 + $0x120] sm:$0xff]  ;;  %v175_v0 = vld [vmem:[#allocation2 + $0x118] sm:$0xff] }
  0x24   :  { %236 = vmatprep.subr.mxu1 %v151_v24  ;;  %v174_v1 = vld [vmem:[#allocation2 + $0x110] sm:$0xff]  ;;  %v173_v2 = vld [vmem:[#allocation2 + $0x108] sm:$0xff]  ;;  %v172_v3 = vld [vmem:[#allocation2 + $0x100] sm:$0xff] }
  0x25   :  { %237 = vmatpush1.msra.mxu1 %v150_v25  ;;  %v320_v4 = vld [vmem:[%s699_s5 + $0xf8] sm:$0xff]  ;;  %v319_v6 = vld [vmem:[%s699_s5 + $0xf0] sm:$0xff]  ;;  %v318_v8 = vld [vmem:[%s699_s5 + $0xe8] sm:$0xff] }
  0x26   :  { %238 = vmatprep.subr.mxu1 %v149_v26  ;;  %v304_v5 = vld [vmem:[%s699_s5 + $0x78] sm:$0xff]  ;;  %438 = vmatprep.subr.mxu0 %v320_v4  ;;  %v303_v7 = vld [vmem:[%s699_s5 + $0x70] sm:$0xff]  ;;  %v302_v9 = vld [vmem:[%s699_s5 + $0x68] sm:$0xff] }
  0x27   :  { %239 = vmatpush1.msra.mxu1 %v148_v27  ;;  %439 = vmatpush3.msra.mxu0 %v304_v5  ;;  %v317_v10 = vld [vmem:[%s699_s5 + $0xe0] sm:$0xff]  ;;  %v316_v12 = vld [vmem:[%s699_s5 + $0xd8] sm:$0xff]  ;;  %v315_v14 = vld [vmem:[%s699_s5 + $0xd0] sm:$0xff] }
  0x28   :  { %240 = vmatprep.subr.mxu1 %v147_v28  ;;  %440 = vmatprep.subr.mxu0 %v319_v6  ;;  %v301_v11 = vld [vmem:[%s699_s5 + $0x60] sm:$0xff]  ;;  %v300_v13 = vld [vmem:[%s699_s5 + $0x58] sm:$0xff]  ;;  %v299_v15 = vld [vmem:[%s699_s5 + $0x50] sm:$0xff]  ;;  %v46_v28 = vlaneseq }
  0x29   :  { %241 = vmatpush1.msra.mxu1 %v146_v29  ;;  %441 = vmatpush3.msra.mxu0 %v303_v7  ;;  %v314_v16 = vld [vmem:[%s699_s5 + $0xc8] sm:$0xff]  ;;  %v313_v18 = vld [vmem:[%s699_s5 + $0xc0] sm:$0xff]  ;;  %v312_v20 = vld [vmem:[%s699_s5 + $0xb8] sm:$0xff] }
  0x2a   :  { %242 = vmatprep.subr.mxu1 %v145_v30  ;;  %442 = vmatprep.subr.mxu0 %v318_v8  ;;  %v298_v17 = vld [vmem:[%s699_s5 + $0x48] sm:$0xff]  ;;  %v297_v19 = vld [vmem:[%s699_s5 + $0x40] sm:$0xff]  ;;  %v296_v21 = vld [vmem:[%s699_s5 + $0x38] sm:$0xff]  ;;  %v47_v29 = vshrl.u32 %v46_v28, 7 }
  0x2b   :  { %243 = vmatpush1.msra.mxu1 %v144_v31  ;;  %443 = vmatpush3.msra.mxu0 %v302_v9  ;;  %v311_v22 = vld [vmem:[%s699_s5 + $0xb0] sm:$0xff]  ;;  %v310_v24 = vld [vmem:[%s699_s5 + $0xa8] sm:$0xff]  ;;  %v309_v26 = vld [vmem:[%s699_s5 + $0xa0] sm:$0xff] }
  0x2c   :  { %244 = vmatprep.subr.mxu1 %v143_v32  ;;  %444 = vmatprep.subr.mxu0 %v317_v10  ;;  %v295_v23 = vld [vmem:[%s699_s5 + $0x30] sm:$0xff]  ;;  %v294_v25 = vld [vmem:[%s699_s5 + $0x28] sm:$0xff]  ;;  %v293_v27 = vld [vmem:[%s699_s5 + $0x20] sm:$0xff]  ;;  %v48_v30 = vsub.s32 0, %v47_v29  ;;  %v52_v32 = vsub.s32 1, %v47_v29 }
  0x2d   :  { %245 = vmatpush1.msra.mxu1 %v142_v33  ;;  %445 = vmatpush3.msra.mxu0 %v301_v11  ;;  %v44_v31 = vld [vmem:[%s696_s2] sm:$0x3] }
  0x2e   :  { %246 = vmatprep.subr.mxu1 %v141_v34  ;;  %446 = vmatprep.subr.mxu0 %v316_v12  ;;  %v49_v33 = vrot.slane %v44_v31, %v48_v30  ;;  %v53_v34 = vrot.slane %v44_v31, %v52_v32 }
  0x2f   :  { %247 = vmatpush1.msra.mxu1 %v140_v35  ;;  %447 = vmatpush3.msra.mxu0 %v300_v13 }
  0x30   :  { %248 = vmatprep.subr.mxu1 %v203_v36  ;;  %448 = vmatprep.subr.mxu0 %v315_v14 }
  0x31   :  { %249 = vmatpush2.msra.mxu1 %v202_v37  ;;  %449 = vmatpush3.msra.mxu0 %v299_v15 }
  0x32   :  { %250 = vmatprep.subr.mxu1 %v201_v38  ;;  %450 = vmatprep.subr.mxu0 %v314_v16 }
  0x33   :  { %251 = vmatpush2.msra.mxu1 %v200_v39  ;;  %451 = vmatpush3.msra.mxu0 %v298_v17 }
  0x34   :  { %252 = vmatprep.subr.mxu1 %v199_v40  ;;  %452 = vmatprep.subr.mxu0 %v313_v18 }
  0x35   :  { %253 = vmatpush2.msra.mxu1 %v198_v41  ;;  %453 = vmatpush3.msra.mxu0 %v297_v19  ;;  %v308_v41 = vld [vmem:[%s699_s5 + $0x98] sm:$0xff] }
  0x36   :  { %254 = vmatprep.subr.mxu1 %v197_v42  ;;  %454 = vmatprep.subr.mxu0 %v312_v20  ;;  %v292_v42 = vld [vmem:[%s699_s5 + $0x18] sm:$0xff] }
  0x37   :  { %255 = vmatpush2.msra.mxu1 %v196_v43  ;;  %455 = vmatpush3.msra.mxu0 %v296_v21  ;;  %v307_v43 = vld [vmem:[%s699_s5 + $0x90] sm:$0xff] }
  0x38   :  { %256 = vmatprep.subr.mxu1 %v195_v44  ;;  %456 = vmatprep.subr.mxu0 %v311_v22  ;;  %v291_v44 = vld [vmem:[%s699_s5 + $0x10] sm:$0xff] }
  0x39   :  { %257 = vmatpush2.msra.mxu1 %v194_v45  ;;  %457 = vmatpush3.msra.mxu0 %v295_v23  ;;  %v306_v45 = vld [vmem:[%s699_s5 + $0x88] sm:$0xff] }
  0x3a   :  { %258 = vmatprep.subr.mxu1 %v193_v46  ;;  %458 = vmatprep.subr.mxu0 %v310_v24  ;;  %v290_v46 = vld [vmem:[%s699_s5 + $0x8] sm:$0xff] }
  0x3b   :  { %259 = vmatpush2.msra.mxu1 %v192_v47  ;;  %459 = vmatpush3.msra.mxu0 %v294_v25  ;;  %v305_v47 = vld [vmem:[%s699_s5 + $0x80] sm:$0xff] }
  0x3c   :  { %260 = vmatprep.subr.mxu1 %v191_v48  ;;  %460 = vmatprep.subr.mxu0 %v309_v26  ;;  %v289_v48 = vld [vmem:[%s699_s5] sm:$0xff] }
  0x3d   :  { %261 = vmatpush2.msra.mxu1 %v190_v49  ;;  %461 = vmatpush3.msra.mxu0 %v293_v27  ;;  %v204_v49 = vld [vmem:[%s698_s4] sm:$0x3]  ;;  %s530_s4 = smov [#allocation5]  }
  0x3e   :  { %262 = vmatprep.subr.mxu1 %v189_v50  ;;  %462 = vmatprep.subr.mxu0 %v308_v41  ;;  %v209_v50 = vrot.slane %v204_v49, %v48_v30 }
  0x3f   :  { %263 = vmatpush2.msra.mxu1 %v188_v51  ;;  %463 = vmatpush3.msra.mxu0 %v292_v42  ;;  %v213_v51 = vrot.slane %v204_v49, %v52_v32 }
  0x40   :  { %264 = vmatprep.subr.mxu1 %v187_v52  ;;  %464 = vmatprep.subr.mxu0 %v307_v43 }
  0x41   :  { %265 = vmatpush2.msra.mxu1 %v186_v53  ;;  %465 = vmatpush3.msra.mxu0 %v291_v44 }
  0x42   :  { %266 = vmatprep.subr.mxu1 %v185_v54  ;;  %466 = vmatprep.subr.mxu0 %v306_v45 }
  0x43   :  { %267 = vmatpush2.msra.mxu1 %v184_v55  ;;  %467 = vmatpush3.msra.mxu0 %v290_v46 }
  0x44   :  { %268 = vmatprep.subr.mxu1 %v183_v56  ;;  %468 = vmatprep.subr.mxu0 %v305_v47 }
  0x45   :  { %269 = vmatpush2.msra.mxu1 %v182_v57  ;;  %469 = vmatpush3.msra.mxu0 %v289_v48 }
  0x46   :  { %270 = vmatprep.subr.mxu1 %v181_v58 }
  0x47   :  { %271 = vmatpush2.msra.mxu1 %v180_v59  ;;  %v399_v59 = vand.u32 127, %v46_v28 }
  0x48   :  { %272 = vmatprep.subr.mxu1 %v179_v60  ;;  %v437_v60 = vld [vmem:[%s700_s6] ss:$0 sm:$0xff]  ;;  %s425_s6 = sshll.u32 %s530_s4, 4  ;;  %s426_s6 = int_to_ptr.vmem [resolvable:$true] %s425_s6 }
  0x49   :  { %273 = vmatpush2.msra.mxu1 %v178_v61  ;;  %vm400_vm2 = vcmp.lt.s32.totalorder %v399_v59, 5  ;;  %vm415_vm3 = vcmp.eq.s32.totalorder %v399_v59, 5  ;;  %s502_s27 = scalar_lea.vmem %s426_s6, 128  ;;  %p507_p6 = scmp.lt.s32.totalorder %s426_s6, %s426_s6 }
  0x4a   :  { %274 = vmatprep.subr.mxu1 %v177_v62  ;;  %p503_p5 = scmp.ne.s32.totalorder %s426_s6, %s502_s27  ;;  %p508_p7 = scmp.lt.s32.totalorder %s502_s27, %s502_s27 }
  0x4b   :  { %275 = vmatpush2.msra.mxu1 %v176_v63 }
  0x4c   :  { %276 = vmatprep.subr.mxu1 %v175_v0  ;;  %p509_p8 = por %p508_p7, %p507_p6 }
  0x4d   :  { %277 = vmatpush2.msra.mxu1 %v174_v1 }
  0x4e   :  { %278 = vmatprep.subr.mxu1 %v173_v2  ;;  %p510_p9 = pnand %p509_p8, %p503_p5 }
  0x4f   :  { %279 = vmatpush2.msra.mxu1 %v172_v3 }
  0xd1   :  { %v133_v35 = vpop.f32.mrf.mxu0 }
  0xd2   :  { %v134_v36 = vadd.f32 %v133_v35, %v49_v33 }
  0xd3   :  { %v135_v37 = vpop.f32.mrf.mxu0 }
  0xd4   :  { %v136_v38 = vadd.f32 %v135_v37, %v53_v34  ;;  %v138_v40 = vmax.f32 %v134_v36, 0.0 }
  0xd6   :  { %v139_v39 = vmax.f32 %v136_v38, 0.0 }
  0xd8   :  { %280 = vmatprep.mubr.f32.mxu1 %v139_v39 }
  0xd9   :  { %281 = vmatmul.mubr.f32.vlgmr.msra.gmra.mxu1 %v138_v40 }
 0x199   :  { %v282_v52 = vpop.f32.mrf.mxu1 }
 0x19a   :  { %v283_v53 = vadd.f32 %v282_v52, %v209_v50 }
 0x19b   :  { %v284_v54 = vpop.f32.mrf.mxu1 }
 0x19c   :  { %v285_v55 = vadd.f32 %v284_v54, %v213_v51  ;;  %v287_v57 = vmax.f32 %v283_v53, 0.0 }
 0x19e   :  { %v288_v56 = vmax.f32 %v285_v55, 0.0 }
 0x1a0   :  { %392 = vmatprep.mubr.f32.mxu0 %v288_v56 }
 0x1a1   :  { %393 = vmatmul.mubr.f32.vlgmr.msra.gmra.mxu0 %v287_v57 }
 0x261   :  { %v470_v58 = vpop.f32.mrf.mxu0 }
 0x263   :  { %v471_v61 = vpop.f32.mrf.mxu0 }
 0x264   :  { %v472_v62 = vadd.f32 %v471_v61, %v470_v58 }
 0x266   :  { %v395_v63 = vadd.f32 %v472_v62, %v437_v60 }
 0x268   :  { %v401_v0 = vsel %vm400_vm2, %v395_v63, -1e+30  ;;  %v416_v1 = vsel %vm415_vm3, %v395_v63, 0.0 }
 0x269   :  { %v403_v2 = vsel %vm402_vm4, %v401_v0, -inf }
 0x26a   :  { %404 = vmax.xlane.f32.xlu0 %v403_v2 }
 0x2f3   :  { %v405_v3 = vpop.xlane.xlu0 %404 }
 0x2f4   :  { %v406_v4 = vsub.f32 %v401_v0, %v405_v3 }
 0x2f6   :  { %v407_v5 = vmul.f32 1.442695, %v406_v4 }
 0x2f8   :  { %478 = vpow2.f32 %v407_v5 }
 0x305   :  { %v479_v6 = vpop.eup %478 }
 0x306   :  { %v409_v7 = vsel %vm400_vm2, %v479_v6, 0.0 }
 0x307   :  { %v410_v8 = vsel %vm402_vm4, %v409_v7, 0.0 }
 0x308   :  { %411 = vadd.xlane.f32.xlu0 %v410_v8 }
 0x391   :  { %v412_v9 = vpop.xlane.xlu0 %411 }
 0x392   :  { %480 = vrcp.f32 %v412_v9 }
 0x39f   :  { %v481_v10 = vpop.eup %480 }
 0x3a0   :  { %v414_v11 = vmul.f32 %v481_v10, %v409_v7 }
 0x3a2   :  { %v417_v12 = vadd.f32 %v416_v1, %v414_v11 }
 0x3a4   :  { %418 = vst.msk [vmem:[#allocation5] sm:$0xff] %vm402_vm4, %v417_v12 }
 0x3a5   :  { %513 = shalt.err (!%p510_p9)
}
 0x3a6   :  { %428 = dma.vmem_to_hbm [thread:$0]  %s426_s6, 128, %s701_s7, [#allocation4]  }
 0x3a7   :  { %524 = dma.done.wait [#allocation4], 128  }
 0x3a8   :  { %525 = vsyncadd [#allocation4], 4294967168 }
 0x3a9   :  { %432 = vsyncpa [#allocation3], 1 }
 0x3aa   :  { %433 = vsyncpa [#allocation4], 1 }

</bundles_post_ra>
